<compile_context>
chip_gen: v7x
topology: tpu7x:2x2x1
jax: 0.10.0
libtpu: 0.0.40
codegen_flags: <defaults>
</compile_context>

<pallas_src>
import numpy as np
import jax
import jax.numpy as jnp
from jax.experimental import pallas as pl
from jax.experimental.pallas import tpu as pltpu

HID1 = 1024      # fc1 output width
OUT = 128        # fc3 output width


def _esm_kernel(x_ref, w1_ref, b1_ref, w3_ref, b3_ref, out_ref):
    f32 = jnp.float32
    # In-kernel bf16 cast of the activations (avoids a separate wrapper-side HBM pass).
    x = x_ref[...].astype(jnp.bfloat16)
    # fc1: (tb, K)bf16 @ (K, 1024)bf16 -> f32 accumulate, + bias, ReLU
    h = jnp.dot(x, w1_ref[...], preferred_element_type=f32) + b1_ref[...]
    h = jnp.maximum(h, 0.0).astype(jnp.bfloat16)
    # fc3: (tb, 1024)bf16 @ (1024, 128)bf16 -> f32 accumulate, + bias, ReLU
    o = jnp.dot(h, w3_ref[...], preferred_element_type=f32) + b3_ref[...]
    out_ref[...] = jnp.maximum(o, 0.0).astype(out_ref.dtype)


def _pick_tb(B, cap=512):
    """Batch tile: large (amortizes per-grid-step overhead + MXU weight push), capped
    at 512 rows (v7x VMEM-safe), multiple of 8, and aiming for >=2 tiles when the
    batch is small so both v7x TensorCores get work."""
    if B >= 2 * cap:
        return cap
    half = -(-B // 2)                      # ceil(B/2) -> at least 2 tiles when B > 8
    tb = ((half + 7) // 8) * 8             # round up to a sublane multiple
    return max(8, min(cap, tb))


def esm_forward(params, x, *, tb=None):
    """Forward pass of ESM_FeatureLearningModel. x: (B, input_size) f32 -> (B, 128) f32."""
    B, K = x.shape
    w1, b1, w3, b3 = params["w1"], params["b1"], params["w3"], params["b3"]
    assert w1.shape == (K, HID1), "input_size mismatch with fc1 weight"
    assert w3.shape == (HID1, OUT)

    if tb is None:
        tb = _pick_tb(B)
    n_tiles = pl.cdiv(B, tb)

    def resident_spec(a):
        # Full array, constant index map (VMEM-resident across the grid),
        # single-buffered: double-buffering a constant block is pure VMEM waste.
        nd = a.ndim
        return pl.BlockSpec(a.shape, lambda i, _nd=nd: (0,) * _nd,
                            pipeline_mode=pl.Buffered(1))

    flops = 2 * B * (K * HID1 + HID1 * OUT)
    bytes_accessed = (B * K * x.dtype.itemsize
                      + int(w1.size) * w1.dtype.itemsize
                      + int(w3.size) * w3.dtype.itemsize
                      + int(b1.size) * 4 + int(b3.size) * 4
                      + B * OUT * 4)

    out = pl.pallas_call(
        _esm_kernel,
        out_shape=jax.ShapeDtypeStruct((B, OUT), jnp.float32),
        grid=(n_tiles,),
        in_specs=[
            pl.BlockSpec((tb, K), lambda i: (i, 0)),    # batch-tiled activations (f32)
            resident_spec(w1), resident_spec(b1),       # resident bf16 weights / f32 biases
            resident_spec(w3), resident_spec(b3),
        ],
        out_specs=pl.BlockSpec((tb, OUT), lambda i: (i, 0)),
        compiler_params=pltpu.CompilerParams(
            dimension_semantics=("parallel",),           # independent batch tiles
            vmem_limit_bytes=48 * 1024 * 1024,           # v7x-safe (<64 MiB physical)
        ),
        cost_estimate=pl.CostEstimate(
            flops=flops, transcendentals=0, bytes_accessed=bytes_accessed),
    )(x, w1, b1, w3, b3)
    return out


def init_params(key, input_size):
    # PyTorch nn.Linear default init: U(-1/sqrt(fan_in), 1/sqrt(fan_in)) for W and b.
    k1, k2, k3, k4 = jax.random.split(key, 4)

    def linear(kw, kb, fan_in, fan_out):
        bound = 1.0 / np.sqrt(fan_in)
        w = jax.random.uniform(kw, (fan_in, fan_out), jnp.float32, -bound, bound)
        b = jax.random.uniform(kb, (1, fan_out), jnp.float32, -bound, bound)
        return w, b

    p = {}
    p["w1"], p["b1"] = linear(k1, k2, input_size, HID1)   # fc1
    p["w3"], p["b3"] = linear(k3, k4, HID1, OUT)          # fc3
    return p


def prepare_params(p):
    """One-time cast: bf16 weights for the MXU, f32 biases (no per-call XLA casts)."""
    return {"w1": p["w1"].astype(jnp.bfloat16),
            "b1": p["b1"].astype(jnp.float32),
            "w3": p["w3"].astype(jnp.bfloat16),
            "b3": p["b3"].astype(jnp.float32)}


def reference_forward(p, x):
    # Plain-JAX f32 reference of the same forward for a sanity check.
    h = jnp.maximum(x @ p["w1"] + p["b1"], 0.0)
    return jnp.maximum(h @ p["w3"] + p["b3"], 0.0)


if __name__ == "__main__":
    key = jax.random.PRNGKey(0)
    kp, kx = jax.random.split(key)

    input_size = 256    # small demo width (real ESM-2 3B embedding would be 2560)
    B = 16              # small demo batch -> tb=8, 2 grid tiles (exercises megacore path)

    params_f32 = init_params(kp, input_size)
    params = prepare_params(params_f32)      # bf16 weights, cast once
    x = jax.random.normal(kx, (B, input_size), jnp.float32)

    out = jax.block_until_ready(esm_forward(params, x))
    assert out.shape == (B, OUT)

    ref = jax.block_until_ready(reference_forward(params_f32, x))
    err = float(jnp.max(jnp.abs(out - ref)) / (jnp.max(jnp.abs(ref)) + 1e-6))
    assert err < 2e-2, f"mismatch vs reference: normalized max err = {err}"

    print("KERNEL_OK")
</pallas_src>

<mosaic_0001>
module attributes {stable_mosaic.version = 11 : i64} {
  func.func @_esm_kernel(%arg0: i32, %arg1: memref<8x256xf32, #tpu.memory_space<vmem>>, %arg2: memref<256x1024xbf16, #tpu.memory_space<vmem>>, %arg3: memref<1x1024xf32, #tpu.memory_space<vmem>>, %arg4: memref<1024x128xbf16, #tpu.memory_space<vmem>>, %arg5: memref<1x128xf32, #tpu.memory_space<vmem>>, %arg6: memref<8x128xf32, #tpu.memory_space<vmem>>) attributes {dimension_semantics = [#tpu.dimension_semantics<parallel>], iteration_bounds = array<i64: 2>, scalar_prefetch = 0 : i64, scratch_operands = 0 : i64, tpu.core_type = #tpu.core_type<tc>, window_params = [{transform_indices = @transform_0, window_bounds = array<i64: 8, 256>}, {pipeline_mode = #tpu.pipeline_mode<synchronous>, transform_indices = @transform_1, window_bounds = array<i64: 256, 1024>}, {pipeline_mode = #tpu.pipeline_mode<synchronous>, transform_indices = @transform_2, window_bounds = array<i64: 1, 1024>}, {pipeline_mode = #tpu.pipeline_mode<synchronous>, transform_indices = @transform_3, window_bounds = array<i64: 1024, 128>}, {pipeline_mode = #tpu.pipeline_mode<synchronous>, transform_indices = @transform_4, window_bounds = array<i64: 1, 128>}, {transform_indices = @transform_5, window_bounds = array<i64: 8, 128>}]} {
    %c0 = arith.constant 0 : index
    %c0_0 = arith.constant 0 : index
    %0 = vector.load %arg1[%c0, %c0_0] : memref<8x256xf32, #tpu.memory_space<vmem>>, vector<8x256xf32>
    %1 = arith.truncf %0 : vector<8x256xf32> to vector<8x256xbf16>
    %c0_1 = arith.constant 0 : index
    %c0_2 = arith.constant 0 : index
    %2 = vector.load %arg2[%c0_1, %c0_2] : memref<256x1024xbf16, #tpu.memory_space<vmem>>, vector<256x1024xbf16>
    %cst = arith.constant dense<0.000000e+00> : vector<8x1024xf32>
    %3 = tpu.matmul %1, %2, %cst {dimension_numbers = #tpu.dot_dimension_numbers<[1], [0], [0], [1], [0, 0, 1, 1], [], []>} : vector<8x256xbf16>, vector<256x1024xbf16>, vector<8x1024xf32> -> vector<8x1024xf32>
    %c0_3 = arith.constant 0 : index
    %c0_4 = arith.constant 0 : index
    %4 = vector.load %arg3[%c0_3, %c0_4] : memref<1x1024xf32, #tpu.memory_space<vmem>>, vector<1x1024xf32>
    %5 = vector.broadcast %4 : vector<1x1024xf32> to vector<8x1024xf32>
    %6 = arith.addf %3, %5 : vector<8x1024xf32>
    %cst_5 = arith.constant 0.000000e+00 : f32
    %7 = vector.broadcast %cst_5 : f32 to vector<8x1024xf32>
    %8 = arith.maximumf %6, %7 : vector<8x1024xf32>
    %9 = arith.truncf %8 : vector<8x1024xf32> to vector<8x1024xbf16>
    %c0_6 = arith.constant 0 : index
    %c0_7 = arith.constant 0 : index
    %10 = vector.load %arg4[%c0_6, %c0_7] : memref<1024x128xbf16, #tpu.memory_space<vmem>>, vector<1024x128xbf16>
    %cst_8 = arith.constant dense<0.000000e+00> : vector<8x128xf32>
    %11 = tpu.matmul %9, %10, %cst_8 {dimension_numbers = #tpu.dot_dimension_numbers<[1], [0], [0], [1], [0, 0, 1, 1], [], []>} : vector<8x1024xbf16>, vector<1024x128xbf16>, vector<8x128xf32> -> vector<8x128xf32>
    %c0_9 = arith.constant 0 : index
    %c0_10 = arith.constant 0 : index
    %12 = vector.load %arg5[%c0_9, %c0_10] : memref<1x128xf32, #tpu.memory_space<vmem>>, vector<1x128xf32>
    %13 = vector.broadcast %12 : vector<1x128xf32> to vector<8x128xf32>
    %14 = arith.addf %11, %13 : vector<8x128xf32>
    %cst_11 = arith.constant 0.000000e+00 : f32
    %15 = vector.broadcast %cst_11 : f32 to vector<8x128xf32>
    %16 = arith.maximumf %14, %15 : vector<8x128xf32>
    %c0_12 = arith.constant 0 : index
    %c0_13 = arith.constant 0 : index
    %17 = vector.load %arg6[%c0_12, %c0_13] : memref<8x128xf32, #tpu.memory_space<vmem>>, vector<8x128xf32>
    tpu.vector_store %arg6[%c0_12, %c0_13], %16 {strides = array<i32>} : memref<8x128xf32, #tpu.memory_space<vmem>>, vector<8x128xf32>,
    return
  }
  func.func @transform_0(%arg0: i32) -> (i32, i32) {
    %c0_i32 = arith.constant 0 : i32
    %c0_i32_0 = arith.constant 0 : i32
    return %arg0, %c0_i32 : i32, i32
  }
  func.func @transform_1(%arg0: i32) -> (i32, i32) {
    %c0_i32 = arith.constant 0 : i32
    %c0_i32_0 = arith.constant 0 : i32
    %c0_i32_1 = arith.constant 0 : i32
    return %c0_i32, %c0_i32_0 : i32, i32
  }
  func.func @transform_2(%arg0: i32) -> (i32, i32) {
    %c0_i32 = arith.constant 0 : i32
    %c0_i32_0 = arith.constant 0 : i32
    %c0_i32_1 = arith.constant 0 : i32
    return %c0_i32, %c0_i32_0 : i32, i32
  }
  func.func @transform_3(%arg0: i32) -> (i32, i32) {
    %c0_i32 = arith.constant 0 : i32
    %c0_i32_0 = arith.constant 0 : i32
    %c0_i32_1 = arith.constant 0 : i32
    return %c0_i32, %c0_i32_0 : i32, i32
  }
  func.func @transform_4(%arg0: i32) -> (i32, i32) {
    %c0_i32 = arith.constant 0 : i32
    %c0_i32_0 = arith.constant 0 : i32
    %c0_i32_1 = arith.constant 0 : i32
    return %c0_i32, %c0_i32_0 : i32, i32
  }
  func.func @transform_5(%arg0: i32) -> (i32, i32) {
    %c0_i32 = arith.constant 0 : i32
    %c0_i32_0 = arith.constant 0 : i32
    return %arg0, %c0_i32 : i32, i32
  }
}

</mosaic_0001>

<bundles_post_ra>
// kernel: tpu_custom_call.1
= control target key start
LH: loop header
LB: loop body
LE: loop exit
PB: predicated region body
PF: predicated region fallthrough
CT: control target
= control target key end

     0   :  { %10 = vsyncpa [#allocation3], 0  ;;  %s3041_s0 = inlined_call_operand.hbm [shape: f32[16,256], index: 0, kind: input, shape index: {}]   ;;  %s3042_s1 = inlined_call_operand.hbm [shape: bf16[256,1024], index: 1, kind: input, shape index: {}]   ;;  %s3043_s2 = inlined_call_operand.hbm [shape: f32[1,1024], index: 2, kind: input, shape index: {}]   ;;  %s3044_s3 = inlined_call_operand.hbm [shape: bf16[1024,128], index: 3, kind: input, shape index: {}]   ;;  %s3045_s4 = inlined_call_operand.vmem [shape: f32[1,128], index: 4, kind: input, shape index: {}]   ;;  %s3046_s5 = inlined_call_operand.hbm [shape: f32[16,128], index: 5, kind: output, shape index: {}]  }
   0x1   :  { %12 = vsyncpa [#allocation3 + $0x1], 0 }
   0x2   :  { %13 = vsyncpa [#allocation6], 0 }
   0x3   :  { %14 = vsyncpa [#allocation9], 0 }
   0x4   :  { %15 = vsyncpa [#allocation4], 0 }
   0x5   :  { %17 = vsyncpa [#allocation4 + $0x1], 0  ;;  %s2747_s18 = smov 0   ;;  %s2749_s19 = smov 0  }
   0x6   :  { %s2751_s20 = smov 0   ;;  %s2753_s21 = smov 0  }
   0x7 LB: > { %s2768_s22 = sadd.s32 4294967295, %s2706_s21   ;;  %s2072_s23 = sadd.s32 4294967294, %s2706_s21   ;;  %s2706_s21 = sphi %s2753_s21, %s3069_s21   ;;  %s2702_s20 = sphi %s2751_s20, %s3068_s20   ;;  %s2698_s19 = sphi %s2749_s19, %s3067_s19   ;;  %s2694_s18 = sphi %s2747_s18, %s3066_s18  }
   0x8   : > { %p43_p0 = scmp.ne.s32.totalorder %s2698_s19, %s2694_s18  ;;  %p3047_p1 = scmp.eq.s32.totalorder %s2768_s22, 0 }
   0x9   : > { %p157_p3 = scmp.eq.s32.totalorder %s2072_s23, 1  ;;  %p2073_p5 = scmp.ge.s32.totalorder %s2706_s21, 1 }
   0xa   : > { %p2777_p4 = por %p3047_p1, %p43_p0  ;;  %p164_p7 = scmp.lt.s32.totalorder %s2706_s21, 3 }
   0xb   : > { %p2782_p6 = por %p157_p3, %p43_p0  ;;  %s2708_s27 = smov [#allocation5]  }
   0xc   : > { %s3050_s24 = scalar_select %p2777_p4, 1, 0 }
   0xd   : > { %s3051_s25 = scalar_select %p2782_p6, 1, 0 }
   0xe   : > { %p2787_p8 = pnand %p2073_p5, %p164_p7  ;;  %s176_s28 = sshll.u32 %s2708_s27, 4  ;;  %s2791_s28 = int_to_ptr.vmem [resolvable:$true] %s176_s28 }
   0xf   : > { %s2709_s30 = smov [#allocation7]   ;;  %s2710_s7 = smov [#allocation8]  }
  0x10   : > { %s3052_s26 = scalar_select %p2787_p8, 1, 0 }
  0x11   : > { %p2389_p9 = pneg %p2787_p8  ;;  %s190_s6 = sshll.u32 %s2709_s30, 4  ;;  %s2802_s6 = int_to_ptr.vmem [resolvable:$true] %s190_s6 }
  0x12   : > { %s2804_s8 = sshll.u32 %s2710_s7, 4  ;;  %s2518_s11 = scalar_lea.hbm %s3042_s1, 16384  ;;  %s201_s8 = int_to_ptr.vmem [resolvable:$true] %s2804_s8 }
  0x13   : > { %p2798_p11 = pnand %p2389_p9, %p3047_p1  ;;  %p2519_p12 = scmp.ne.s32.totalorder %s3042_s1, %s2518_s11 }
  0x14   : > { %p2525_p5 = scmp.lt.u32.totalorder %s2518_s11, %s3042_s1 }
  0x15   : > { %p2814_p13 = pneg %p2798_p11 }
  0x17   : > { %p2521_p0 = pnand %p2814_p13, %p2519_p12 }
  0x19   : > { %p2522_p3 = pneg %p2521_p0 }
  0x1b   : > { %p2527_p7 = pnand %p2525_p5, %p2522_p3 }
  0x1d   : > { %2530 = shalt.err (!%p2527_p7)
}
  0x1e   : > { %s2531_s17 = scalar_lea.vmem %s2791_s28, 16384  ;;  %p2539_p2 = scmp.lt.s32.totalorder %s2791_s28, %s2791_s28 }
  0x1f   : > { %p2532_p9 = scmp.ne.s32.totalorder %s2791_s28, %s2531_s17  ;;  %p2540_p6 = scmp.lt.s32.totalorder %s2531_s17, %s2531_s17 }
  0x21   : > { %p2534_p10 = pnand %p2532_p9, %p2814_p13  ;;  %p2541_p12 = por %p2540_p6, %p2539_p2 }
  0x23   : > { %p2535_p1 = pneg %p2534_p10 }
  0x25   : > { %p2542_p0 = pnand %p2541_p12, %p2535_p1 }
  0x27   : > { %2545 = shalt.err (!%p2542_p0)
}
  0x28   : > { %s2711_s23 = smov 512   ;;  %s2712_s27 = smov 32  }
  0x29   : > { %2392 = dma.hbm_to_vmem [thread:$0]  (!%p2798_p11), %s3042_s1, 16384, %s2791_s28, [#allocation6], %s2711_s23, %s2711_s23, %s2712_s27  }
  0x2a   : > { %s2546_s11 = scalar_lea.hbm %s3043_s2, 128 }
  0x2b   : > { %p2547_p2 = scmp.ne.s32.totalorder %s3043_s2, %s2546_s11  ;;  %p2553_p10 = scmp.lt.u32.totalorder %s2546_s11, %s3043_s2 }
  0x2d   : > { %p2549_p1 = pnand %p2547_p2, %p2814_p13 }
  0x2f   : > { %p2550_p6 = pneg %p2549_p1 }
  0x31   : > { %p2555_p3 = pnand %p2553_p10, %p2550_p6 }
  0x33   : > { %2558 = shalt.err (!%p2555_p3)
}
  0x34   : > { %s2559_s28 = scalar_lea.vmem %s2802_s6, 128  ;;  %p2567_p12 = scmp.lt.s32.totalorder %s2802_s6, %s2802_s6 }
  0x35   : > { %p2560_p5 = scmp.ne.s32.totalorder %s2802_s6, %s2559_s28  ;;  %p2568_p0 = scmp.lt.s32.totalorder %s2559_s28, %s2559_s28 }
  0x37   : > { %p2562_p7 = pnand %p2560_p5, %p2814_p13  ;;  %p2569_p2 = por %p2568_p0, %p2567_p12 }
  0x39   : > { %p2563_p9 = pneg %p2562_p7 }
  0x3b   : > { %p2570_p1 = pnand %p2569_p2, %p2563_p9 }
  0x3d   : > { %2573 = shalt.err (!%p2570_p1)
}
  0x3e   : > { %2395 = dma.hbm_to_vmem [thread:$0]  (!%p2798_p11), %s3043_s2, 128, %s2802_s6, [#allocation6]  }
  0x3f   : > { %s2574_s7 = scalar_lea.hbm %s3044_s3, 8192 }
  0x40   : > { %p2575_p6 = scmp.ne.s32.totalorder %s3044_s3, %s2574_s7  ;;  %p2581_p5 = scmp.lt.u32.totalorder %s2574_s7, %s3044_s3 }
  0x42   : > { %p2577_p10 = pnand %p2575_p6, %p2814_p13 }
  0x44   : > { %p2578_p3 = pneg %p2577_p10 }
  0x46   : > { %p2583_p7 = pnand %p2581_p5, %p2578_p3 }
  0x48   : > { %2586 = shalt.err (!%p2583_p7)
}
  0x49   : > { %s2587_s13 = scalar_lea.vmem %s201_s8, 8192  ;;  %p2595_p2 = scmp.lt.s32.totalorder %s201_s8, %s201_s8 }
  0x4a   : > { %p2588_p9 = scmp.ne.s32.totalorder %s201_s8, %s2587_s13  ;;  %p2596_p1 = scmp.lt.s32.totalorder %s2587_s13, %s2587_s13 }
  0x4c   : > { %p2590_p12 = pnand %p2588_p9, %p2814_p13  ;;  %p2597_p4 = por %p2596_p1, %p2595_p2 }
  0x4e   : > { %p2591_p0 = pneg %p2590_p12 }
  0x50   : > { %p2598_p8 = pnand %p2597_p4, %p2591_p0 }
  0x52   : > { %2601 = shalt.err (!%p2598_p8)
}
  0x53   : > { %s2713_s6 = smov 64   ;;  %s2714_s14 = smov 4  }
  0x54   : > { %2398 = dma.hbm_to_vmem [thread:$0]  (!%p2798_p11), %s3044_s3, 8192, %s201_s8, [#allocation9], %s2713_s6, %s2713_s6, %s2714_s14  }
  0x55   : > { %s2878_s28 = sadd.s32 1, %s2706_s21   ;;  %s30_s23 = sadd.s32 1, %s2702_s20 }
  0x56   : > { %s27_s17 = ssub.s32 %s2706_s21, %s2878_s28  ;;  %p37_p8 = scmp.ne.s32.totalorder %s2702_s20, %s2698_s19 }
  0x57   : > { %p28_p4 = scmp.eq.s32.totalorder %s27_s17, 0  ;;  %p38_p13 = scmp.eq.s32.totalorder %s2706_s21, 0 }
  0x58   : > { %p2410_p6 = scmp.lt.s32.totalorder %s2706_s21, 2  ;;  %p3055_p3 = scmp.eq.s32.totalorder %s2768_s22, 1 }
  0x59   : > { %s2888_s27 = scalar_select %p28_p4, %s2702_s20, %s30_s23  }
  0x5a   : > { %p39_p10 = por %p38_p13, %p37_p8  ;;  %p2892_p5 = por %p3055_p3, %p37_p8 }
  0x5b   : > { %s217_s29 = sand.u32 1, %s2702_s20   ;;  %s2284_s7 = sshll.u32 %s2706_s21, 8 }
  0x5c   : > { %s2078_s8 = sshll.u32 %s217_s29, 4  ;;  %s2901_s11 = scalar_lea.hbm %s3041_s0, %s2284_s7 }
  0x5d   : > { %s221_s12 = scalar_lea.vmem [#allocation2], %s2078_s8  ;;  %p2903_p11 = pnand %p2410_p6, %p39_p10 }
  0x5e   : > { %s229_s13 = sshll.u32 %s221_s12, 4  ;;  %s218_s14 = scalar_lea.sflag [#allocation3], %s217_s29  ;;  %s2907_s13 = int_to_ptr.vmem [resolvable:$true] %s229_s13 }
  0x5f   : > { %s2602_s15 = scalar_lea.hbm %s2901_s11, 256  ;;  %p2604_p9 = pneg %p2903_p11 }
  0x60   : > { %p2603_p7 = scmp.ne.s32.totalorder %s2901_s11, %s2602_s15  ;;  %s2607_s23 = scalar_lea.hbm %s3041_s0, 512 }
  0x61   : > { %p2608_p2 = scmp.lt.u32.totalorder %s2901_s11, %s3041_s0  ;;  %p2609_p1 = scmp.lt.u32.totalorder %s2607_s23, %s2602_s15 }
  0x62   : > { %p2605_p12 = pnand %p2604_p9, %p2603_p7  ;;  %p2611_p8 = scmp.lt.u32.totalorder %s2602_s15, %s2901_s11 }
  0x63   : > { %p2610_p4 = por %p2609_p1, %p2608_p2 }
  0x64   : > { %p2606_p0 = pneg %p2605_p12 }
  0x65   : > { %p2612_p13 = por %p2611_p8, %p2610_p4 }
  0x67   : > { %p2613_p6 = pnand %p2612_p13, %p2606_p0 }
  0x69   : > { %2616 = shalt.err (!%p2613_p6)
}
  0x6a   : > { %s2617_s29 = scalar_lea.vmem %s2907_s13, 256  ;;  %s2715_s9 = smov [#allocation2]  }
  0x6b   : > { %p2618_p10 = scmp.ne.s32.totalorder %s2907_s13, %s2617_s29  ;;  %s2622_s10 = sshll.u32 %s2715_s9, 4  ;;  %s2623_s10 = int_to_ptr.vmem [resolvable:$false] %s2622_s10 }
  0x6c   : > { %s2624_s12 = scalar_lea.vmem %s2623_s10, 512  ;;  %p2625_p12 = scmp.lt.s32.totalorder %s2907_s13, %s2623_s10 }
  0x6d   : > { %p2620_p3 = pnand %p2618_p10, %p2604_p9  ;;  %p2626_p2 = scmp.lt.s32.totalorder %s2624_s12, %s2617_s29 }
  0x6f   : > { %p2621_p7 = pneg %p2620_p3  ;;  %p2627_p1 = por %p2626_p2, %p2625_p12 }
  0x71   : > { %p2628_p4 = pnand %p2627_p1, %p2621_p7 }
  0x73   : > { %2631 = shalt.err (!%p2628_p4)
}
  0x74   : > { %2402 = dma.hbm_to_vmem [thread:$0]  (!%p2903_p11), %s2901_s11, 256, %s2907_s13, %s218_s14  }
  0x75   : > { %p3058_p0 = scmp.ne.s32.totalorder %s3052_s26, 0 }
  0x76   : > { %s2937_s15 = sand.u32 (!%p3058_p0), 1, %s2698_s19   ;;  %p3059_p9 = scmp.ne.s32.totalorder (!%p3058_p0), %s3050_s24, 0 }
  0x77   : > { %238 = sbr.rel (%p3058_p0) target bundleno = 721 (0x2d1), region = 40  ;;  %s2082_s16 = sshll.u32 (!%p3058_p0), %s2937_s15, 4 }
  0x78   : > { %s241_s17 = scalar_lea.sflag (!%p3058_p0), [#allocation3], %s2937_s15  ;;  %s2941_s23 = scalar_lea.vmem (!%p3058_p0), [#allocation2], %s2082_s16 }
  0x7e   : > { %2677 = dma.done.wait (%p3059_p9), %s241_s17, 256  }
  0x7f   : > { %2679 = vsyncadd (%p3059_p9), %s241_s17, 4294967040  ;;  %p3060_p11 = scmp.eq.s32.totalorder %s2768_s22, 0 }
  0x81   : > { %2681 = dma.done.wait (%p3060_p11), [#allocation6], 16512   ;;  %p3061_p8 = pmov %p3060_p11 }
  0x83   : > { %2683 = vsyncadd (%p3061_p8), [#allocation6], 4294950784  ;;  %p3062_p13 = pmov %p3061_p8 }
  0x84   : > { %p3063_p6 = pmov %p3061_p8 }
  0x85   : > { %2685 = dma.done.wait (%p3062_p13), [#allocation9], 8192  }
  0x86   : > { %2687 = vsyncadd (%p3063_p6), [#allocation9], 4294959104  ;;  %v288_v0 = vld [vmem:[#allocation5] sm:$0xff]  ;;  %v289_v2 = vld [vmem:[#allocation5 + $0x8] sm:$0xff]  ;;  %s2086_s11 = sshll.u32 %s2937_s15, 3  ;;  %s2281_s13 = sshll.u32 %s2768_s22, 7 }
  0x87   : > { %v292_v1 = vld [vmem:[#allocation5 + $0x20] sm:$0xff]  ;;  %v293_v4 = vld [vmem:[#allocation5 + $0x28] sm:$0xff]  ;;  %s282_s6 = scalar_lea.vmem [#allocation10], %s2086_s11  ;;  %s2997_s29 = scalar_lea.hbm %s3046_s5, %s2281_s13 }
  0x88   : > { %v2088_v3 = vcombine.high %v288_v0, %v292_v1  ;;  %v2087_v5 = vcombine.low %v288_v0, %v292_v1  ;;  %v296_v6 = vld [vmem:[#allocation5 + $0x40] sm:$0xff]  ;;  %v2090_v8 = vcombine.high %v289_v2, %v293_v4  ;;  %v2089_v9 = vcombine.low %v289_v2, %v293_v4  ;;  %v297_v11 = vld [vmem:[#allocation5 + $0x48] sm:$0xff]  ;;  %s1973_s14 = sshll.u32 %s282_s6, 4  ;;  %s1960_s9 = scalar_lea.sflag [#allocation4], %s2937_s15  ;;  %s2999_s14 = int_to_ptr.vmem [resolvable:$true] %s1973_s14 }
  0x89   : > { %v300_v7 = vld [vmem:[#allocation5 + $0x60] sm:$0xff]  ;;  %v301_v12 = vld [vmem:[#allocation5 + $0x68] sm:$0xff]  ;;  %s2632_s10 = scalar_lea.vmem %s2999_s14, 128  ;;  %s2716_s22 = smov [#allocation10]  }
  0x8a   : > { %v2096_v10 = vcombine.high %v296_v6, %v300_v7  ;;  %v304_v13 = vld [vmem:[#allocation5 + $0x80] sm:$0xff]  ;;  %1098 = vmatprep.subr.bf16.mxu0 %v2088_v3  ;;  %v2098_v14 = vcombine.high %v297_v11, %v301_v12  ;;  %v305_v16 = vld [vmem:[#allocation5 + $0x88] sm:$0xff]  ;;  %1139 = vmatprep.subr.bf16.mxu1 %v2090_v8  ;;  %v2095_v18 = vcombine.low %v296_v6, %v300_v7  ;;  %p2633_p10 = scmp.ne.s32.totalorder %s2999_s14, %s2632_s10  ;;  %s2636_s12 = sshll.u32 %s2716_s22, 4  ;;  %s2637_s12 = int_to_ptr.vmem [resolvable:$false] %s2636_s12 }
  0x8b   : > { %v308_v15 = vld [vmem:[#allocation5 + $0xa0] sm:$0xff]  ;;  %v309_v17 = vld [vmem:[#allocation5 + $0xa8] sm:$0xff]  ;;  %1099 = vmatpush1.bf16.msra.mxu0 %v2087_v5  ;;  %1140 = vmatpush1.bf16.msra.mxu1 %v2089_v9  ;;  %v2097_v19 = vcombine.low %v297_v11, %v301_v12  ;;  %s2638_s16 = scalar_lea.vmem %s2637_s12, 256  ;;  %p2639_p12 = scmp.lt.s32.totalorder %s2999_s14, %s2637_s12 }
  0x8c   : > { %1100 = vmatprep.subr.bf16.mxu0 %v2096_v10  ;;  %v2104_v20 = vcombine.high %v304_v13, %v308_v15  ;;  %1141 = vmatprep.subr.bf16.mxu1 %v2098_v14  ;;  %v2106_v21 = vcombine.high %v305_v16, %v309_v17  ;;  %v312_v22 = vld [vmem:[#allocation5 + $0xc0] sm:$0xff]  ;;  %v313_v24 = vld [vmem:[#allocation5 + $0xc8] sm:$0xff]  ;;  %v2103_v26 = vcombine.low %v304_v13, %v308_v15  ;;  %p2634_p3 = pnand %p2633_p10, %p2892_p5  ;;  %p2640_p2 = scmp.lt.s32.totalorder %s2638_s16, %s2632_s10 }
  0x8d   : > { %v316_v23 = vld [vmem:[#allocation5 + $0xe0] sm:$0xff]  ;;  %v317_v25 = vld [vmem:[#allocation5 + $0xe8] sm:$0xff]  ;;  %v2105_v27 = vcombine.low %v305_v16, %v309_v17 }
  0x8e   : > { %v2112_v28 = vcombine.high %v312_v22, %v316_v23  ;;  %v2114_v29 = vcombine.high %v313_v24, %v317_v25  ;;  %v320_v30 = vld [vmem:[#allocation5 + $0x100] sm:$0xff]  ;;  %v321_v32 = vld [vmem:[#allocation5 + $0x108] sm:$0xff]  ;;  %v2111_v34 = vcombine.low %v312_v22, %v316_v23  ;;  %v2113_v35 = vcombine.low %v313_v24, %v317_v25  ;;  %p2635_p7 = pneg %p2634_p3  ;;  %p2641_p1 = por %p2640_p2, %p2639_p12 }
  0x8f   : > { %1101 = vmatpush1.bf16.msra.mxu0 %v2095_v18  ;;  %1142 = vmatpush1.bf16.msra.mxu1 %v2097_v19  ;;  %v324_v31 = vld [vmem:[#allocation5 + $0x120] sm:$0xff]  ;;  %v325_v33 = vld [vmem:[#allocation5 + $0x128] sm:$0xff] }
  0x90   : > { %1102 = vmatprep.subr.bf16.mxu0 %v2104_v20  ;;  %1143 = vmatprep.subr.bf16.mxu1 %v2106_v21  ;;  %v2120_v36 = vcombine.high %v320_v30, %v324_v31  ;;  %v2122_v37 = vcombine.high %v321_v32, %v325_v33  ;;  %v328_v38 = vld [vmem:[#allocation5 + $0x140] sm:$0xff]  ;;  %v329_v40 = vld [vmem:[#allocation5 + $0x148] sm:$0xff]  ;;  %v2119_v42 = vcombine.low %v320_v30, %v324_v31  ;;  %p2642_p4 = pnand %p2641_p1, %p2635_p7 }
  0x91   : > { %v332_v39 = vld [vmem:[#allocation5 + $0x160] sm:$0xff]  ;;  %v333_v41 = vld [vmem:[#allocation5 + $0x168] sm:$0xff]  ;;  %v2121_v43 = vcombine.low %v321_v32, %v325_v33 }
  0x92   : > { %v2128_v44 = vcombine.high %v328_v38, %v332_v39  ;;  %v2130_v45 = vcombine.high %v329_v40, %v333_v41  ;;  %v336_v46 = vld [vmem:[#allocation5 + $0x180] sm:$0xff]  ;;  %v337_v48 = vld [vmem:[#allocation5 + $0x188] sm:$0xff]  ;;  %v2127_v50 = vcombine.low %v328_v38, %v332_v39  ;;  %v2129_v51 = vcombine.low %v329_v40, %v333_v41 }
  0x93   : > { %1103 = vmatpush1.bf16.msra.mxu0 %v2103_v26  ;;  %1144 = vmatpush1.bf16.msra.mxu1 %v2105_v27  ;;  %v340_v47 = vld [vmem:[#allocation5 + $0x1a0] sm:$0xff]  ;;  %v341_v49 = vld [vmem:[#allocation5 + $0x1a8] sm:$0xff] }
  0x94   : > { %1104 = vmatprep.subr.bf16.mxu0 %v2112_v28  ;;  %1145 = vmatprep.subr.bf16.mxu1 %v2114_v29  ;;  %v2136_v52 = vcombine.high %v336_v46, %v340_v47  ;;  %v285_v53 = vld [vmem:[%s2941_s23 + $0x8] sm:$0xff]  ;;  %v2138_v54 = vcombine.high %v337_v48, %v341_v49  ;;  %v344_v55 = vld [vmem:[#allocation5 + $0x1c0] sm:$0xff]  ;;  %v2135_v60 = vcombine.low %v336_v46, %v340_v47 }
  0x95   : > { %v348_v56 = vld [vmem:[#allocation5 + $0x1e0] sm:$0xff]  ;;  %v2956_v57 = vpack.c.bf16 %v285_v53, %v285_v53  ;;  %v345_v58 = vld [vmem:[#allocation5 + $0x1c8] sm:$0xff]  ;;  %v2137_v61 = vcombine.low %v337_v48, %v341_v49 }
  0x96   : > { %v349_v59 = vld [vmem:[#allocation5 + $0x1e8] sm:$0xff]  ;;  %v2144_v62 = vcombine.high %v344_v55, %v348_v56  ;;  %v352_v0 = vld [vmem:[#allocation5 + $0x200] sm:$0xff]  ;;  %v2143_v4 = vcombine.low %v344_v55, %v348_v56 }
  0x97   : > { %1105 = vmatpush1.bf16.msra.mxu0 %v2111_v34  ;;  %1146 = vmatpush1.bf16.msra.mxu1 %v2113_v35  ;;  %v2146_v63 = vcombine.high %v345_v58, %v349_v59  ;;  %v356_v1 = vld [vmem:[#allocation5 + $0x220] sm:$0xff]  ;;  %v353_v2 = vld [vmem:[#allocation5 + $0x208] sm:$0xff]  ;;  %v2145_v5 = vcombine.low %v345_v58, %v349_v59 }
  0x98   : > { %1106 = vmatprep.subr.bf16.mxu0 %v2120_v36  ;;  %1147 = vmatprep.subr.bf16.mxu1 %v2122_v37  ;;  %v357_v3 = vld [vmem:[#allocation5 + $0x228] sm:$0xff]  ;;  %v2152_v6 = vcombine.high %v352_v0, %v356_v1  ;;  %v360_v8 = vld [vmem:[#allocation5 + $0x240] sm:$0xff]  ;;  %v2151_v12 = vcombine.low %v352_v0, %v356_v1  ;;  %v294_v1 = vld [vmem:[#allocation5 + $0x30] sm:$0xff] }
  0x99   : > { %1130 = vmatprep.mubr.bf16.mxu0 %v2956_v57  ;;  %1171 = vmatprep.mubr.bf16.mxu1 %v2956_v57  ;;  %v2154_v7 = vcombine.high %v353_v2, %v357_v3  ;;  %v364_v9 = vld [vmem:[#allocation5 + $0x260] sm:$0xff]  ;;  %v361_v10 = vld [vmem:[#allocation5 + $0x248] sm:$0xff]  ;;  %v2153_v13 = vcombine.low %v353_v2, %v357_v3 }
  0x9a   : > { %v365_v11 = vld [vmem:[#allocation5 + $0x268] sm:$0xff]  ;;  %v2160_v14 = vcombine.high %v360_v8, %v364_v9  ;;  %v368_v16 = vld [vmem:[#allocation5 + $0x280] sm:$0xff]  ;;  %v2159_v20 = vcombine.low %v360_v8, %v364_v9 }
  0x9b   : > { %1107 = vmatpush1.bf16.msra.mxu0 %v2119_v42  ;;  %1148 = vmatpush1.bf16.msra.mxu1 %v2121_v43  ;;  %v2162_v15 = vcombine.high %v361_v10, %v365_v11  ;;  %v372_v17 = vld [vmem:[#allocation5 + $0x2a0] sm:$0xff]  ;;  %v369_v18 = vld [vmem:[#allocation5 + $0x288] sm:$0xff]  ;;  %v2161_v21 = vcombine.low %v361_v10, %v365_v11  ;;  %v302_v10 = vld [vmem:[#allocation5 + $0x70] sm:$0xff] }
  0x9c   : > { %1108 = vmatprep.subr.bf16.mxu0 %v2128_v44  ;;  %1149 = vmatprep.subr.bf16.mxu1 %v2130_v45  ;;  %v373_v19 = vld [vmem:[#allocation5 + $0x2a8] sm:$0xff]  ;;  %v2168_v22 = vcombine.high %v368_v16, %v372_v17  ;;  %v376_v24 = vld [vmem:[#allocation5 + $0x2c0] sm:$0xff]  ;;  %v2167_v28 = vcombine.low %v368_v16, %v372_v17 }
  0x9d   : > { %v2170_v23 = vcombine.high %v369_v18, %v373_v19  ;;  %v380_v25 = vld [vmem:[#allocation5 + $0x2e0] sm:$0xff]  ;;  %v377_v26 = vld [vmem:[#allocation5 + $0x2c8] sm:$0xff]  ;;  %v2169_v29 = vcombine.low %v369_v18, %v373_v19  ;;  %v306_v18 = vld [vmem:[#allocation5 + $0x90] sm:$0xff] }
  0x9e   : > { %v381_v27 = vld [vmem:[#allocation5 + $0x2e8] sm:$0xff]  ;;  %v2176_v30 = vcombine.high %v376_v24, %v380_v25  ;;  %v384_v32 = vld [vmem:[#allocation5 + $0x300] sm:$0xff]  ;;  %v2175_v36 = vcombine.low %v376_v24, %v380_v25  ;;  %v314_v24 = vld [vmem:[#allocation5 + $0xd0] sm:$0xff] }
  0x9f   : > { %1109 = vmatpush1.bf16.msra.mxu0 %v2127_v50  ;;  %1150 = vmatpush1.bf16.msra.mxu1 %v2129_v51  ;;  %v2178_v31 = vcombine.high %v377_v26, %v381_v27  ;;  %v388_v33 = vld [vmem:[#allocation5 + $0x320] sm:$0xff]  ;;  %v385_v34 = vld [vmem:[#allocation5 + $0x308] sm:$0xff]  ;;  %v2177_v38 = vcombine.low %v377_v26, %v381_v27  ;;  %v318_v25 = vld [vmem:[#allocation5 + $0xf0] sm:$0xff] }
  0xa0   : > { %1110 = vmatprep.subr.bf16.mxu0 %v2136_v52  ;;  %1151 = vmatprep.subr.bf16.mxu1 %v2138_v54  ;;  %v389_v35 = vld [vmem:[#allocation5 + $0x328] sm:$0xff]  ;;  %v392_v37 = vld [vmem:[#allocation5 + $0x340] sm:$0xff]  ;;  %v2184_v39 = vcombine.high %v384_v32, %v388_v33  ;;  %v2183_v44 = vcombine.low %v384_v32, %v388_v33  ;;  %v322_v32 = vld [vmem:[#allocation5 + $0x110] sm:$0xff] }
  0xa1   : > { %v396_v40 = vld [vmem:[#allocation5 + $0x360] sm:$0xff]  ;;  %v2186_v41 = vcombine.high %v385_v34, %v389_v35  ;;  %v393_v42 = vld [vmem:[#allocation5 + $0x348] sm:$0xff]  ;;  %v2185_v46 = vcombine.low %v385_v34, %v389_v35  ;;  %v326_v33 = vld [vmem:[#allocation5 + $0x130] sm:$0xff]  ;;  %v2116_v35 = vcombine.high %v314_v24, %v318_v25 }
  0xa2   : > { %v397_v43 = vld [vmem:[#allocation5 + $0x368] sm:$0xff]  ;;  %v400_v45 = vld [vmem:[#allocation5 + $0x380] sm:$0xff]  ;;  %v2192_v47 = vcombine.high %v392_v37, %v396_v40  ;;  %v2191_v52 = vcombine.low %v392_v37, %v396_v40  ;;  %v327_v37 = vld [vmem:[#allocation5 + $0x138] sm:$0xff] }
  0xa3   : > { %1111 = vmatpush1.bf16.msra.mxu0 %v2135_v60  ;;  %1152 = vmatpush1.bf16.msra.mxu1 %v2137_v61  ;;  %v404_v48 = vld [vmem:[#allocation5 + $0x3a0] sm:$0xff]  ;;  %v2194_v49 = vcombine.high %v393_v42, %v397_v43  ;;  %v401_v50 = vld [vmem:[#allocation5 + $0x388] sm:$0xff]  ;;  %v2193_v54 = vcombine.low %v393_v42, %v397_v43  ;;  %v330_v40 = vld [vmem:[#allocation5 + $0x150] sm:$0xff] }
  0xa4   : > { %1112 = vmatprep.subr.bf16.mxu0 %v2144_v62  ;;  %1153 = vmatprep.subr.bf16.mxu1 %v2146_v63  ;;  %v405_v51 = vld [vmem:[#allocation5 + $0x3a8] sm:$0xff]  ;;  %v408_v53 = vld [vmem:[#allocation5 + $0x3c0] sm:$0xff]  ;;  %v2200_v55 = vcombine.high %v400_v45, %v404_v48  ;;  %v2199_v61 = vcombine.low %v400_v45, %v404_v48  ;;  %v290_v62 = vld [vmem:[#allocation5 + $0x10] sm:$0xff] }
  0xa5   : > { %v412_v56 = vld [vmem:[#allocation5 + $0x3e0] sm:$0xff]  ;;  %v2202_v58 = vcombine.high %v401_v50, %v405_v51  ;;  %v409_v59 = vld [vmem:[#allocation5 + $0x3c8] sm:$0xff]  ;;  %v2201_v63 = vcombine.low %v401_v50, %v405_v51  ;;  %v2092_v9 = vcombine.high %v290_v62, %v294_v1  ;;  %v331_v43 = vld [vmem:[#allocation5 + $0x158] sm:$0xff] }
  0xa6   : > { %v413_v60 = vld [vmem:[#allocation5 + $0x3e8] sm:$0xff]  ;;  %v2208_v0 = vcombine.high %v408_v53, %v412_v56  ;;  %v284_v3 = vld [vmem:[%s2941_s23] sm:$0xff]  ;;  %v339_v51 = vld [vmem:[#allocation5 + $0x198] sm:$0xff] }
  0xa7   : > { %1113 = vmatpush1.bf16.msra.mxu0 %v2143_v4  ;;  %1154 = vmatpush1.bf16.msra.mxu1 %v2145_v5  ;;  %v2210_v2 = vcombine.high %v409_v59, %v413_v60  ;;  %v291_v4 = vld [vmem:[#allocation5 + $0x18] sm:$0xff]  ;;  %v2209_v8 = vcombine.low %v409_v59, %v413_v60  ;;  %v342_v48 = vld [vmem:[#allocation5 + $0x1b0] sm:$0xff] }
  0xa8   : > { %1114 = vmatprep.subr.bf16.mxu0 %v2152_v6  ;;  %1155 = vmatprep.subr.bf16.mxu1 %v2154_v7  ;;  %v295_v5 = vld [vmem:[#allocation5 + $0x38] sm:$0xff]  ;;  %v2207_v6 = vcombine.low %v408_v53, %v412_v56  ;;  %v298_v7 = vld [vmem:[#allocation5 + $0x50] sm:$0xff] }
  0xa9   : > { %v2094_v11 = vcombine.high %v291_v4, %v295_v5  ;;  %v2093_v16 = vcombine.low %v291_v4, %v295_v5  ;;  %v2100_v17 = vcombine.high %v298_v7, %v302_v10  ;;  %v350_v56 = vld [vmem:[#allocation5 + $0x1f0] sm:$0xff]  ;;  %v347_v60 = vld [vmem:[#allocation5 + $0x1d8] sm:$0xff] }
  0xaa   : > { %v355_v4 = vld [vmem:[#allocation5 + $0x218] sm:$0xff] }
  0xab   : > { %1115 = vmatpush1.bf16.msra.mxu0 %v2151_v12  ;;  %1156 = vmatpush1.bf16.msra.mxu1 %v2153_v13  ;;  %v299_v12 = vld [vmem:[#allocation5 + $0x58] sm:$0xff]  ;;  %v2961_v13 = vpack.c.bf16 %v284_v3, %v284_v3 }
  0xac   : > { %1116 = vmatprep.subr.bf16.mxu0 %v2160_v14  ;;  %1157 = vmatprep.subr.bf16.mxu1 %v2162_v15  ;;  %v303_v14 = vld [vmem:[#allocation5 + $0x78] sm:$0xff]  ;;  %v2091_v15 = vcombine.low %v290_v62, %v294_v1  ;;  %v358_v1 = vld [vmem:[#allocation5 + $0x230] sm:$0xff] }
  0xad   : > { %v2102_v19 = vcombine.high %v299_v12, %v303_v14  ;;  %v2101_v26 = vcombine.low %v299_v12, %v303_v14  ;;  %v359_v5 = vld [vmem:[#allocation5 + $0x238] sm:$0xff]  ;;  %v366_v12 = vld [vmem:[#allocation5 + $0x270] sm:$0xff] }
  0xae   : > { %v363_v14 = vld [vmem:[#allocation5 + $0x258] sm:$0xff] }
  0xaf   : > { %1117 = vmatpush1.bf16.msra.mxu0 %v2159_v20  ;;  %1158 = vmatpush1.bf16.msra.mxu1 %v2161_v21  ;;  %v310_v20 = vld [vmem:[#allocation5 + $0xb0] sm:$0xff]  ;;  %v307_v21 = vld [vmem:[#allocation5 + $0x98] sm:$0xff] }
  0xb0   : > { %1118 = vmatprep.subr.bf16.mxu0 %v2168_v22  ;;  %1159 = vmatprep.subr.bf16.mxu1 %v2170_v23  ;;  %v311_v22 = vld [vmem:[#allocation5 + $0xb8] sm:$0xff]  ;;  %v2099_v23 = vcombine.low %v298_v7, %v302_v10  ;;  %v2108_v27 = vcombine.high %v306_v18, %v310_v20  ;;  %v2158_v10 = vcombine.high %v355_v4, %v359_v5 }
  0xb1   : > { %v2109_v34 = vcombine.low %v307_v21, %v311_v22 }
  0xb3   : > { %1119 = vmatpush1.bf16.msra.mxu0 %v2167_v28  ;;  %1160 = vmatpush1.bf16.msra.mxu1 %v2169_v29  ;;  %v315_v28 = vld [vmem:[#allocation5 + $0xd8] sm:$0xff] }
  0xb4   : > { %1120 = vmatprep.subr.bf16.mxu0 %v2176_v30  ;;  %1161 = vmatprep.subr.bf16.mxu1 %v2178_v31  ;;  %v319_v29 = vld [vmem:[#allocation5 + $0xf8] sm:$0xff]  ;;  %v2110_v30 = vcombine.high %v307_v21, %v311_v22  ;;  %v2107_v31 = vcombine.low %v306_v18, %v310_v20  ;;  %v370_v20 = vld [vmem:[#allocation5 + $0x290] sm:$0xff] }
  0xb5   : > { %v2117_v42 = vcombine.low %v315_v28, %v319_v29  ;;  %v374_v21 = vld [vmem:[#allocation5 + $0x2b0] sm:$0xff]  ;;  %v371_v22 = vld [vmem:[#allocation5 + $0x298] sm:$0xff] }
  0xb7   : > { %1121 = vmatpush1.bf16.msra.mxu0 %v2175_v36  ;;  %1162 = vmatpush1.bf16.msra.mxu1 %v2177_v38  ;;  %v323_v36 = vld [vmem:[#allocation5 + $0x118] sm:$0xff]  ;;  %v2118_v38 = vcombine.high %v315_v28, %v319_v29  ;;  %v378_v28 = vld [vmem:[#allocation5 + $0x2d0] sm:$0xff] }
  0xb8   : > { %1122 = vmatprep.subr.bf16.mxu0 %v2184_v39  ;;  %1163 = vmatprep.subr.bf16.mxu1 %v2186_v41  ;;  %v2115_v39 = vcombine.low %v314_v24, %v318_v25  ;;  %v334_v41 = vld [vmem:[#allocation5 + $0x170] sm:$0xff]  ;;  %v2126_v45 = vcombine.high %v323_v36, %v327_v37 }
  0xb9   : > { %v2132_v50 = vcombine.high %v330_v40, %v334_v41  ;;  %v382_v29 = vld [vmem:[#allocation5 + $0x2f0] sm:$0xff] }
  0xbb   : > { %1123 = vmatpush1.bf16.msra.mxu0 %v2183_v44  ;;  %1164 = vmatpush1.bf16.msra.mxu1 %v2185_v46  ;;  %v335_v44 = vld [vmem:[#allocation5 + $0x178] sm:$0xff]  ;;  %v2123_v46 = vcombine.low %v322_v32, %v326_v33 }
  0xbc   : > { %1124 = vmatprep.subr.bf16.mxu0 %v2192_v47  ;;  %1165 = vmatprep.subr.bf16.mxu1 %v2194_v49  ;;  %v338_v47 = vld [vmem:[#allocation5 + $0x190] sm:$0xff]  ;;  %v2125_v49 = vcombine.low %v323_v36, %v327_v37  ;;  %v2134_v53 = vcombine.high %v331_v43, %v335_v44 }
  0xbd   : > { %v2140_v59 = vcombine.high %v338_v47, %v342_v48  ;;  %v386_v36 = vld [vmem:[#allocation5 + $0x310] sm:$0xff] }
  0xbe   : > { %v390_v37 = vld [vmem:[#allocation5 + $0x330] sm:$0xff] }
  0xbf   : > { %1125 = vmatpush1.bf16.msra.mxu0 %v2191_v52  ;;  %1166 = vmatpush1.bf16.msra.mxu1 %v2193_v54  ;;  %v343_v52 = vld [vmem:[#allocation5 + $0x1b8] sm:$0xff]  ;;  %v2131_v54 = vcombine.low %v330_v40, %v334_v41  ;;  %v2179_v40 = vcombine.low %v378_v28, %v382_v29 }
  0xc0   : > { %1126 = vmatprep.subr.bf16.mxu0 %v2200_v55  ;;  %1167 = vmatprep.subr.bf16.mxu1 %v2202_v58  ;;  %v346_v55 = vld [vmem:[#allocation5 + $0x1d0] sm:$0xff]  ;;  %v2133_v58 = vcombine.low %v331_v43, %v335_v44  ;;  %v2142_v62 = vcombine.high %v339_v51, %v343_v52 }
  0xc1   : > { %v2148_v3 = vcombine.high %v346_v55, %v350_v56  ;;  %v2147_v7 = vcombine.low %v346_v55, %v350_v56  ;;  %v394_v43 = vld [vmem:[#allocation5 + $0x350] sm:$0xff] }
  0xc2   : > { %v398_v44 = vld [vmem:[#allocation5 + $0x370] sm:$0xff] }
  0xc3   : > { %1127 = vmatpush1.bf16.msra.mxu0 %v2199_v61  ;;  %1168 = vmatpush1.bf16.msra.mxu1 %v2201_v63  ;;  %v351_v61 = vld [vmem:[#allocation5 + $0x1f8] sm:$0xff]  ;;  %v2139_v63 = vcombine.low %v338_v47, %v342_v48  ;;  %v2187_v47 = vcombine.low %v386_v36, %v390_v37  ;;  %v2195_v55 = vcombine.low %v394_v43, %v398_v44 }
  0xc4   : > { %1128 = vmatprep.subr.bf16.mxu0 %v2208_v0  ;;  %1169 = vmatprep.subr.bf16.mxu1 %v2210_v2  ;;  %v354_v0 = vld [vmem:[#allocation5 + $0x210] sm:$0xff]  ;;  %v2141_v2 = vcombine.low %v339_v51, %v343_v52 }
  0xc5   : > { %v402_v51 = vld [vmem:[#allocation5 + $0x390] sm:$0xff] }
  0xc6   : > { %v406_v52 = vld [vmem:[#allocation5 + $0x3b0] sm:$0xff] }
  0xc7   : > { %1129 = vmatpush1.bf16.msra.mxu0 %v2207_v6  ;;  %1170 = vmatpush1.bf16.msra.mxu1 %v2209_v8  ;;  %v2150_v6 = vcombine.high %v347_v60, %v351_v61  ;;  %v2149_v8 = vcombine.low %v347_v60, %v351_v61  ;;  %v410_v60 = vld [vmem:[#allocation5 + $0x3d0] sm:$0xff] }
  0xc8   : > { %1180 = vmatprep.subr.bf16.mxu0 %v2092_v9  ;;  %1221 = vmatprep.subr.bf16.mxu1 %v2094_v11  ;;  %v2156_v9 = vcombine.high %v354_v0, %v358_v1  ;;  %v362_v11 = vld [vmem:[#allocation5 + $0x250] sm:$0xff] }
  0xc9   : > { %v2164_v18 = vcombine.high %v362_v11, %v366_v12  ;;  %v2163_v24 = vcombine.low %v362_v11, %v366_v12  ;;  %v414_v61 = vld [vmem:[#allocation5 + $0x3f0] sm:$0xff] }
  0xca   : > { %1131 = vmatmul.mubr.bf16.vlgmr.msra.gmra.mrb[0].mxu0 %v2961_v13  ;;  %1172 = vmatmul.mubr.bf16.vlgmr.msra.gmra.mrb[0].mxu1 %v2961_v13  ;;  %v2459_v11 = vld [vmem:[#allocation8 + $0xc8] sm:$0xff]  }
  0xcb   : > { %1181 = vmatpush1.bf16.msra.mxu0 %v2091_v15  ;;  %1222 = vmatpush1.bf16.msra.mxu1 %v2093_v16  ;;  %v367_v15 = vld [vmem:[#allocation5 + $0x278] sm:$0xff]  ;;  %v2155_v16 = vcombine.low %v354_v0, %v358_v1  ;;  %v2203_v0 = vcombine.low %v402_v51, %v406_v52  ;;  %v2460_v12 = vld [vmem:[#allocation8 + $0x8] sm:$0xff]  }
  0xcc   : > { %1182 = vmatprep.subr.bf16.mxu0 %v2100_v17  ;;  %1223 = vmatprep.subr.bf16.mxu1 %v2102_v19  ;;  %v2157_v17 = vcombine.low %v355_v4, %v359_v5  ;;  %v2166_v19 = vcombine.high %v363_v14, %v367_v15  ;;  %v2165_v25 = vcombine.low %v363_v14, %v367_v15  ;;  %v2461_v14 = vld [vmem:[#allocation8 + $0x88] sm:$0xff]   ;;  %v2462_v15 = vld [vmem:[#allocation8 + $0x50] sm:$0xff]  }
  0xcd   : > { %1212 = vmatprep.mubr.bf16.mxu0 %v2956_v57  ;;  %1253 = vmatprep.mubr.bf16.mxu1 %v2956_v57  ;;  %v2124_v57 = vcombine.high %v322_v32, %v326_v33  ;;  %v2171_v32 = vcombine.low %v370_v20, %v374_v21  ;;  %v2211_v4 = vcombine.low %v410_v60, %v414_v61 }
  0xcf   : > { %1183 = vmatpush1.bf16.msra.mxu0 %v2099_v23  ;;  %1224 = vmatpush1.bf16.msra.mxu1 %v2101_v26  ;;  %v375_v23 = vld [vmem:[#allocation5 + $0x2b8] sm:$0xff]  ;;  %v2172_v26 = vcombine.high %v370_v20, %v374_v21  ;;  %v2467_v20 = vld [vmem:[#allocation8 + $0xd8] sm:$0xff]  }
  0xd0   : > { %1184 = vmatprep.subr.bf16.mxu0 %v2108_v27  ;;  %1225 = vmatprep.subr.bf16.mxu1 %v2110_v30  ;;  %v2174_v27 = vcombine.high %v371_v22, %v375_v23  ;;  %v379_v30 = vld [vmem:[#allocation5 + $0x2d8] sm:$0xff]  ;;  %v2173_v33 = vcombine.low %v371_v22, %v375_v23  ;;  %v2468_v21 = vld [vmem:[#allocation8 + $0x18] sm:$0xff]   ;;  %v2470_v22 = vld [vmem:[#allocation8 + $0x60] sm:$0xff]  }
  0xd1   : > { %v2471_v23 = vld [vmem:[#allocation8 + $0xe0] sm:$0xff]  }
  0xd3   : > { %1185 = vmatpush1.bf16.msra.mxu0 %v2107_v31  ;;  %1226 = vmatpush1.bf16.msra.mxu1 %v2109_v34  ;;  %v383_v31 = vld [vmem:[#allocation5 + $0x2f8] sm:$0xff]  ;;  %v2180_v34 = vcombine.high %v378_v28, %v382_v29  ;;  %v2476_v28 = vld [vmem:[#allocation8 + $0x28] sm:$0xff]  }
  0xd4   : > { %1186 = vmatprep.subr.bf16.mxu0 %v2116_v35  ;;  %1227 = vmatprep.subr.bf16.mxu1 %v2118_v38  ;;  %v2182_v35 = vcombine.high %v379_v30, %v383_v31  ;;  %v387_v38 = vld [vmem:[#allocation5 + $0x318] sm:$0xff]  ;;  %v2181_v41 = vcombine.low %v379_v30, %v383_v31  ;;  %v2477_v29 = vld [vmem:[#allocation8 + $0xa8] sm:$0xff]  }
  0xd5   : > { %v2478_v30 = vld [vmem:[#allocation8 + $0x70] sm:$0xff]  }
  0xd6   : > { %v2479_v31 = vld [vmem:[#allocation8 + $0xf0] sm:$0xff]  }
  0xd7   : > { %1187 = vmatpush1.bf16.msra.mxu0 %v2115_v39  ;;  %1228 = vmatpush1.bf16.msra.mxu1 %v2117_v42  ;;  %v391_v39 = vld [vmem:[#allocation5 + $0x338] sm:$0xff]  ;;  %v2188_v42 = vcombine.high %v386_v36, %v390_v37  ;;  %v2484_v36 = vld [vmem:[#allocation8 + $0x38] sm:$0xff]  }
  0xd8   : > { %1188 = vmatprep.subr.bf16.mxu0 %v2124_v57  ;;  %1229 = vmatprep.subr.bf16.mxu1 %v2126_v45  ;;  %v2190_v57 = vcombine.high %v387_v38, %v391_v39  ;;  %v395_v45 = vld [vmem:[#allocation5 + $0x358] sm:$0xff]  ;;  %v2189_v48 = vcombine.low %v387_v38, %v391_v39  ;;  %v2485_v37 = vld [vmem:[#allocation8 + $0xb8] sm:$0xff]   ;;  %v2486_v38 = vld [vmem:[#allocation8 + $0x140] sm:$0xff]  }
  0xd9   : > { %v2487_v39 = vld [vmem:[#allocation8 + $0x1c0] sm:$0xff]  }
  0xdb   : > { %1189 = vmatpush1.bf16.msra.mxu0 %v2123_v46  ;;  %1230 = vmatpush1.bf16.msra.mxu1 %v2125_v49  ;;  %v399_v46 = vld [vmem:[#allocation5 + $0x378] sm:$0xff]  ;;  %v2196_v49 = vcombine.high %v394_v43, %v398_v44 }
  0xdc   : > { %1190 = vmatprep.subr.bf16.mxu0 %v2132_v50  ;;  %1231 = vmatprep.subr.bf16.mxu1 %v2134_v53  ;;  %v2198_v50 = vcombine.high %v395_v45, %v399_v46  ;;  %v403_v53 = vld [vmem:[#allocation5 + $0x398] sm:$0xff]  ;;  %v2197_v56 = vcombine.low %v395_v45, %v399_v46 }
  0xdf   : > { %1191 = vmatpush1.bf16.msra.mxu0 %v2131_v54  ;;  %1232 = vmatpush1.bf16.msra.mxu1 %v2133_v58  ;;  %v407_v54 = vld [vmem:[#allocation5 + $0x3b8] sm:$0xff]  ;;  %v2204_v58 = vcombine.high %v402_v51, %v406_v52 }
  0xe0   : > { %1192 = vmatprep.subr.bf16.mxu0 %v2140_v59  ;;  %1233 = vmatprep.subr.bf16.mxu1 %v2142_v62  ;;  %v2206_v59 = vcombine.high %v403_v53, %v407_v54  ;;  %v411_v62 = vld [vmem:[#allocation5 + $0x3d8] sm:$0xff]  ;;  %v2205_v1 = vcombine.low %v403_v53, %v407_v54 }
  0xe3   : > { %1193 = vmatpush1.bf16.msra.mxu0 %v2139_v63  ;;  %1234 = vmatpush1.bf16.msra.mxu1 %v2141_v2  ;;  %v415_v63 = vld [vmem:[#allocation5 + $0x3f8] sm:$0xff]  ;;  %v2212_v2 = vcombine.high %v410_v60, %v414_v61 }
  0xe4   : > { %1194 = vmatprep.subr.bf16.mxu0 %v2148_v3  ;;  %1235 = vmatprep.subr.bf16.mxu1 %v2150_v6  ;;  %v2214_v3 = vcombine.high %v411_v62, %v415_v63  ;;  %v2213_v5 = vcombine.low %v411_v62, %v415_v63  ;;  %v2454_v6 = vld [vmem:[#allocation8 + $0x40] sm:$0xff]  }
  0xe7   : > { %1195 = vmatpush1.bf16.msra.mxu0 %v2147_v7  ;;  %1236 = vmatpush1.bf16.msra.mxu1 %v2149_v8  ;;  %v2455_v7 = vld [vmem:[#allocation8 + $0xc0] sm:$0xff]  }
  0xe8   : > { %1196 = vmatprep.subr.bf16.mxu0 %v2156_v9  ;;  %1237 = vmatprep.subr.bf16.mxu1 %v2158_v10  ;;  %v2456_v8 = vld [vmem:[#allocation8] sm:$0xff]   ;;  %v2458_v10 = vld [vmem:[#allocation8 + $0x48] sm:$0xff]  }
  0xe9   : > { %v2457_v9 = vld [vmem:[#allocation8 + $0x80] sm:$0xff]  }
  0xeb   : > { %1197 = vmatpush1.bf16.msra.mxu0 %v2155_v16  ;;  %1238 = vmatpush1.bf16.msra.mxu1 %v2157_v17  ;;  %v2463_v16 = vld [vmem:[#allocation8 + $0xd0] sm:$0xff]  }
  0xec   : > { %1198 = vmatprep.subr.bf16.mxu0 %v2164_v18  ;;  %1239 = vmatprep.subr.bf16.mxu1 %v2166_v19  ;;  %v2464_v17 = vld [vmem:[#allocation8 + $0x10] sm:$0xff]   ;;  %v2466_v19 = vld [vmem:[#allocation8 + $0x58] sm:$0xff]  }
  0xed   : > { %v2465_v18 = vld [vmem:[#allocation8 + $0x90] sm:$0xff]  }
  0xef   : > { %1199 = vmatpush1.bf16.msra.mxu0 %v2163_v24  ;;  %1240 = vmatpush1.bf16.msra.mxu1 %v2165_v25  ;;  %v2472_v24 = vld [vmem:[#allocation8 + $0x20] sm:$0xff]  }
  0xf0   : > { %1200 = vmatprep.subr.bf16.mxu0 %v2172_v26  ;;  %1241 = vmatprep.subr.bf16.mxu1 %v2174_v27  ;;  %v2473_v25 = vld [vmem:[#allocation8 + $0xa0] sm:$0xff]   ;;  %v2474_v26 = vld [vmem:[#allocation8 + $0x68] sm:$0xff]  }
  0xf1   : > { %v2475_v27 = vld [vmem:[#allocation8 + $0xe8] sm:$0xff]  }
  0xf3   : > { %1201 = vmatpush1.bf16.msra.mxu0 %v2171_v32  ;;  %1242 = vmatpush1.bf16.msra.mxu1 %v2173_v33  ;;  %v2480_v32 = vld [vmem:[#allocation8 + $0x30] sm:$0xff]  }
  0xf4   : > { %1202 = vmatprep.subr.bf16.mxu0 %v2180_v34  ;;  %1243 = vmatprep.subr.bf16.mxu1 %v2182_v35  ;;  %v2481_v33 = vld [vmem:[#allocation8 + $0xb0] sm:$0xff]   ;;  %v2482_v34 = vld [vmem:[#allocation8 + $0x78] sm:$0xff]  }
  0xf5   : > { %v2483_v35 = vld [vmem:[#allocation8 + $0xf8] sm:$0xff]  }
  0xf7   : > { %1203 = vmatpush1.bf16.msra.mxu0 %v2179_v40  ;;  %1244 = vmatpush1.bf16.msra.mxu1 %v2181_v41  ;;  %v418_v40 = vlaneseq }
  0xf8   : > { %1204 = vmatprep.subr.bf16.mxu0 %v2188_v42  ;;  %1245 = vmatprep.subr.bf16.mxu1 %v2190_v57  ;;  %v2972_v57 = vld [vmem:[#allocation7] sm:$0xff] }
  0xf9   : > { %v2969_v41 = vshrl.u32 %v418_v40, 7 }
  0xfb   : > { %1205 = vmatpush1.bf16.msra.mxu0 %v2187_v47  ;;  %1246 = vmatpush1.bf16.msra.mxu1 %v2189_v48  ;;  %v420_v42 = vsub.s32 0, %v2969_v41  ;;  %v428_v43 = vsub.s32 2, %v2969_v41  ;;  %v424_v44 = vsub.s32 1, %v2969_v41  ;;  %v432_v45 = vsub.s32 3, %v2969_v41 }
  0xfc   : > { %1206 = vmatprep.subr.bf16.mxu0 %v2196_v49  ;;  %1247 = vmatprep.subr.bf16.mxu1 %v2198_v50  ;;  %v448_v40 = vsub.s32 7, %v2969_v41 }
  0xfd   : > { %v421_v46 = vrot.slane %v2972_v57, %v420_v42  ;;  %v429_v47 = vrot.slane %v2972_v57, %v428_v43  ;;  %v425_v48 = vrot.slane %v2972_v57, %v424_v44  ;;  %v433_v49 = vrot.slane %v2972_v57, %v432_v45 }
  0xfe   : > { %v449_v45 = vrot.slane %v2972_v57, %v448_v40 }
  0xff   : > { %1207 = vmatpush1.bf16.msra.mxu0 %v2195_v55  ;;  %1248 = vmatpush1.bf16.msra.mxu1 %v2197_v56 }
 0x100   : > { %1208 = vmatprep.subr.bf16.mxu0 %v2204_v58  ;;  %1249 = vmatprep.subr.bf16.mxu1 %v2206_v59 }
 0x103   : > { %1209 = vmatpush1.bf16.msra.mxu0 %v2203_v0  ;;  %1250 = vmatpush1.bf16.msra.mxu1 %v2205_v1 }
 0x104   : > { %1210 = vmatprep.subr.bf16.mxu0 %v2212_v2  ;;  %1251 = vmatprep.subr.bf16.mxu1 %v2214_v3 }
 0x107   : > { %1211 = vmatpush1.bf16.msra.mxu0 %v2211_v4  ;;  %1252 = vmatpush1.bf16.msra.mxu1 %v2213_v5 }
 0x108   : > { %2285 = vmatprep.subr.bf16.mxu0 %v2454_v6  ;;  %2307 = vmatprep.subr.bf16.mxu1 %v2455_v7  ;;  %v2488_v6 = vld [vmem:[#allocation8 + $0x100] sm:$0xff]  }
 0x10a   : > { %1213 = vmatmul.mubr.bf16.vlgmr.msra.gmra.mrb[4].mxu0 %v2961_v13  ;;  %1254 = vmatmul.mubr.bf16.vlgmr.msra.gmra.mrb[4].mxu1 %v2961_v13  ;;  %v2469_v13 = vld [vmem:[#allocation8 + $0x98] sm:$0xff]  }
 0x10b   : > { %2286 = vmatpush3.bf16.msra.mxu0 %v2456_v8  ;;  %2308 = vmatpush3.bf16.msra.mxu1 %v2457_v9  ;;  %v2489_v8 = vld [vmem:[#allocation8 + $0x180] sm:$0xff]   ;;  %v2490_v9 = vld [vmem:[#allocation8 + $0x148] sm:$0xff]  }
 0x10c   : > { %2287 = vmatprep.subr.bf16.mxu0 %v2458_v10  ;;  %2309 = vmatprep.subr.bf16.mxu1 %v2459_v11  ;;  %v2491_v10 = vld [vmem:[#allocation8 + $0x1c8] sm:$0xff]  }
 0x10d   : > { %v2492_v11 = vld [vmem:[#allocation8 + $0x108] sm:$0xff]  }
 0x10f   : > { %2288 = vmatpush3.bf16.msra.mxu0 %v2460_v12  ;;  %2310 = vmatpush3.bf16.msra.mxu1 %v2461_v14  ;;  %v2493_v12 = vld [vmem:[#allocation8 + $0x188] sm:$0xff]   ;;  %v2494_v14 = vld [vmem:[#allocation8 + $0x150] sm:$0xff]  }
 0x110   : > { %2289 = vmatprep.subr.bf16.mxu0 %v2462_v15  ;;  %2311 = vmatprep.subr.bf16.mxu1 %v2463_v16  ;;  %v2495_v15 = vld [vmem:[#allocation8 + $0x1d0] sm:$0xff]  }
 0x111   : > { %v2496_v16 = vld [vmem:[#allocation8 + $0x110] sm:$0xff]  }
 0x113   : > { %2290 = vmatpush3.bf16.msra.mxu0 %v2464_v17  ;;  %2312 = vmatpush3.bf16.msra.mxu1 %v2465_v18  ;;  %v2497_v17 = vld [vmem:[#allocation8 + $0x190] sm:$0xff]   ;;  %v2498_v18 = vld [vmem:[#allocation8 + $0x158] sm:$0xff]  }
 0x114   : > { %2291 = vmatprep.subr.bf16.mxu0 %v2466_v19  ;;  %2313 = vmatprep.subr.bf16.mxu1 %v2467_v20  ;;  %v2499_v19 = vld [vmem:[#allocation8 + $0x1d8] sm:$0xff]  }
 0x115   : > { %v2500_v20 = vld [vmem:[#allocation8 + $0x118] sm:$0xff]  }
 0x117   : > { %2292 = vmatpush3.bf16.msra.mxu0 %v2468_v21  ;;  %2314 = vmatpush3.bf16.msra.mxu1 %v2469_v13  ;;  %v2501_v21 = vld [vmem:[#allocation8 + $0x198] sm:$0xff]   ;;  %v2502_v13 = vld [vmem:[#allocation8 + $0x160] sm:$0xff]  }
 0x118   : > { %2293 = vmatprep.subr.bf16.mxu0 %v2470_v22  ;;  %2315 = vmatprep.subr.bf16.mxu1 %v2471_v23  ;;  %v2503_v22 = vld [vmem:[#allocation8 + $0x1e0] sm:$0xff]  }
 0x119   : > { %v2504_v23 = vld [vmem:[#allocation8 + $0x120] sm:$0xff]  }
 0x11b   : > { %2294 = vmatpush3.bf16.msra.mxu0 %v2472_v24  ;;  %2316 = vmatpush3.bf16.msra.mxu1 %v2473_v25  ;;  %v2505_v24 = vld [vmem:[#allocation8 + $0x1a0] sm:$0xff]   ;;  %v2506_v25 = vld [vmem:[#allocation8 + $0x168] sm:$0xff]  }
 0x11c   : > { %2295 = vmatprep.subr.bf16.mxu0 %v2474_v26  ;;  %2317 = vmatprep.subr.bf16.mxu1 %v2475_v27  ;;  %v2507_v26 = vld [vmem:[#allocation8 + $0x1e8] sm:$0xff]  }
 0x11d   : > { %v2508_v27 = vld [vmem:[#allocation8 + $0x128] sm:$0xff]  }
 0x11f   : > { %2296 = vmatpush3.bf16.msra.mxu0 %v2476_v28  ;;  %2318 = vmatpush3.bf16.msra.mxu1 %v2477_v29  ;;  %v2509_v28 = vld [vmem:[#allocation8 + $0x1a8] sm:$0xff]   ;;  %v2510_v29 = vld [vmem:[#allocation8 + $0x170] sm:$0xff]  }
 0x120   : > { %2297 = vmatprep.subr.bf16.mxu0 %v2478_v30  ;;  %2319 = vmatprep.subr.bf16.mxu1 %v2479_v31  ;;  %v2511_v30 = vld [vmem:[#allocation8 + $0x1f0] sm:$0xff]  }
 0x121   : > { %v2512_v31 = vld [vmem:[#allocation8 + $0x130] sm:$0xff]  }
 0x123   : > { %2298 = vmatpush3.bf16.msra.mxu0 %v2480_v32  ;;  %2320 = vmatpush3.bf16.msra.mxu1 %v2481_v33  ;;  %v2513_v32 = vld [vmem:[#allocation8 + $0x1b0] sm:$0xff]   ;;  %v2514_v33 = vld [vmem:[#allocation8 + $0x178] sm:$0xff]  }
 0x124   : > { %2299 = vmatprep.subr.bf16.mxu0 %v2482_v34  ;;  %2321 = vmatprep.subr.bf16.mxu1 %v2483_v35  ;;  %v2515_v34 = vld [vmem:[#allocation8 + $0x1f8] sm:$0xff]  }
 0x125   : > { %v2516_v35 = vld [vmem:[#allocation8 + $0x138] sm:$0xff]  }
 0x127   : > { %2300 = vmatpush3.bf16.msra.mxu0 %v2484_v36  ;;  %2322 = vmatpush3.bf16.msra.mxu1 %v2485_v37  ;;  %v2517_v36 = vld [vmem:[#allocation8 + $0x1b8] sm:$0xff]   ;;  %v436_v37 = vsub.s32 4, %v2969_v41 }
 0x128   : > { %2329 = vmatprep.subr.bf16.mxu0 %v2486_v38  ;;  %2351 = vmatprep.subr.bf16.mxu1 %v2487_v39  ;;  %v444_v38 = vsub.s32 6, %v2969_v41  ;;  %v440_v39 = vsub.s32 5, %v2969_v41 }
 0x129   : > { %v437_v42 = vrot.slane %v2972_v57, %v436_v37 }
 0x12a   : > { %v445_v43 = vrot.slane %v2972_v57, %v444_v38  ;;  %v441_v44 = vrot.slane %v2972_v57, %v440_v39 }
 0x19d   : > { %v1132_v50 = vpop.f32.mrb[0].mxu0  ;;  %v1173_v52 = vpop.f32.mrb[0].mxu1 }
 0x19e   : > { %v1133_v51 = vadd.f32 %v1132_v50, %v421_v46  ;;  %v1134_v53 = vpop.f32.mrb[1].mxu0  ;;  %v1174_v54 = vadd.f32 %v1173_v52, %v429_v47  ;;  %v1175_v56 = vpop.f32.mrb[1].mxu1 }
 0x19f   : > { %v1135_v55 = vadd.f32 %v1134_v53, %v425_v48  ;;  %v1136_v58 = vpop.f32.mrb[2].mxu0  ;;  %v1176_v60 = vadd.f32 %v1175_v56, %v433_v49  ;;  %v1177_v61 = vpop.f32.mrb[2].mxu1 }
 0x1a0   : > { %v1262_v59 = vmax.f32 %v1133_v51, 0.0  ;;  %v1137_v62 = vpop.f32.mrb[3].mxu0  ;;  %v1264_v63 = vmax.f32 %v1174_v54, 0.0  ;;  %v1178_v1 = vpop.f32.mrb[3].mxu1 }
 0x1a1   : > { %v1263_v0 = vmax.f32 %v1135_v55, 0.0  ;;  %v1265_v3 = vmax.f32 %v1176_v60, 0.0 }
 0x1a2   : > { %v1270_v2 = vpack.c.bf16 %v1262_v59, %v1262_v59  ;;  %v1272_v4 = vpack.c.bf16 %v1264_v63, %v1264_v63 }
 0x1a3   : > { %v1271_v5 = vpack.c.bf16 %v1263_v0, %v1263_v0  ;;  %v1273_v7 = vpack.c.bf16 %v1265_v3, %v1265_v3  ;;  %v2215_v3 = vld [vmem:[%s3045_s4] ss:$0 sm:$0xff] }
 0x1a5   : > { %1829 = vmatprep.mubr.bf16.mxu0 %v1271_v5  ;;  %1869 = vmatprep.mubr.bf16.mxu1 %v1273_v7 }
 0x1a6   : > { %1830 = vmatmul.mubr.bf16.vlgmr.msra.gmra.mrb[8].mxu0 %v1270_v2  ;;  %1870 = vmatmul.mubr.bf16.vlgmr.msra.gmra.mrb[8].mxu1 %v1272_v4 }
 0x1a7   : > { %2330 = vmatpush3.bf16.msra.mxu0 %v2488_v6  ;;  %2352 = vmatpush3.bf16.msra.mxu1 %v2489_v8 }
 0x1a8   : > { %2331 = vmatprep.subr.bf16.mxu0 %v2490_v9  ;;  %2353 = vmatprep.subr.bf16.mxu1 %v2491_v10 }
 0x1ab   : > { %2332 = vmatpush3.bf16.msra.mxu0 %v2492_v11  ;;  %2354 = vmatpush3.bf16.msra.mxu1 %v2493_v12 }
 0x1ac   : > { %2333 = vmatprep.subr.bf16.mxu0 %v2494_v14  ;;  %2355 = vmatprep.subr.bf16.mxu1 %v2495_v15 }
 0x1af   : > { %2334 = vmatpush3.bf16.msra.mxu0 %v2496_v16  ;;  %2356 = vmatpush3.bf16.msra.mxu1 %v2497_v17 }
 0x1b0   : > { %2335 = vmatprep.subr.bf16.mxu0 %v2498_v18  ;;  %2357 = vmatprep.subr.bf16.mxu1 %v2499_v19 }
 0x1b3   : > { %2336 = vmatpush3.bf16.msra.mxu0 %v2500_v20  ;;  %2358 = vmatpush3.bf16.msra.mxu1 %v2501_v21 }
 0x1b4   : > { %2337 = vmatprep.subr.bf16.mxu0 %v2502_v13  ;;  %2359 = vmatprep.subr.bf16.mxu1 %v2503_v22 }
 0x1b7   : > { %2338 = vmatpush3.bf16.msra.mxu0 %v2504_v23  ;;  %2360 = vmatpush3.bf16.msra.mxu1 %v2505_v24 }
 0x1b8   : > { %2339 = vmatprep.subr.bf16.mxu0 %v2506_v25  ;;  %2361 = vmatprep.subr.bf16.mxu1 %v2507_v26 }
 0x1bb   : > { %2340 = vmatpush3.bf16.msra.mxu0 %v2508_v27  ;;  %2362 = vmatpush3.bf16.msra.mxu1 %v2509_v28 }
 0x1bc   : > { %2341 = vmatprep.subr.bf16.mxu0 %v2510_v29  ;;  %2363 = vmatprep.subr.bf16.mxu1 %v2511_v30 }
 0x1bf   : > { %2342 = vmatpush3.bf16.msra.mxu0 %v2512_v31  ;;  %2364 = vmatpush3.bf16.msra.mxu1 %v2513_v32 }
 0x1c0   : > { %2343 = vmatprep.subr.bf16.mxu0 %v2514_v33  ;;  %2365 = vmatprep.subr.bf16.mxu1 %v2515_v34 }
 0x1c3   : > { %2344 = vmatpush3.bf16.msra.mxu0 %v2516_v35  ;;  %2366 = vmatpush3.bf16.msra.mxu1 %v2517_v36 }
 0x1dd   : > { %v1214_v46 = vpop.f32.mrb[4].mxu0  ;;  %v1255_v48 = vpop.f32.mrb[4].mxu1 }
 0x1de   : > { %v1215_v47 = vadd.f32 %v1214_v46, %v437_v42  ;;  %v1216_v49 = vpop.f32.mrb[5].mxu0  ;;  %v1256_v50 = vadd.f32 %v1255_v48, %v445_v43  ;;  %v1257_v52 = vpop.f32.mrb[5].mxu1 }
 0x1df   : > { %v1217_v51 = vadd.f32 %v1216_v49, %v441_v44  ;;  %v1218_v53 = vpop.f32.mrb[6].mxu0  ;;  %v1258_v55 = vadd.f32 %v1257_v52, %v449_v45  ;;  %v1259_v56 = vpop.f32.mrb[6].mxu1 }
 0x1e0   : > { %v1266_v54 = vmax.f32 %v1215_v47, 0.0  ;;  %v1219_v41 = vpop.f32.mrb[7].mxu0  ;;  %v1268_v58 = vmax.f32 %v1256_v50, 0.0  ;;  %v1260_v60 = vpop.f32.mrb[7].mxu1 }
 0x1e1   : > { %v1267_v59 = vmax.f32 %v1217_v51, 0.0  ;;  %v1269_v61 = vmax.f32 %v1258_v55, 0.0 }
 0x1e2   : > { %v1276_v62 = vpack.c.bf16 %v1268_v58, %v1268_v58  ;;  %v1274_v0 = vpack.c.bf16 %v1266_v54, %v1266_v54 }
 0x1e3   : > { %v1275_v63 = vpack.c.bf16 %v1267_v59, %v1267_v59  ;;  %v1277_v57 = vpack.c.bf16 %v1269_v61, %v1269_v61 }
 0x1e5   : > { %1909 = vmatprep.mubr.bf16.mxu0 %v1275_v63  ;;  %1949 = vmatprep.mubr.bf16.mxu1 %v1277_v57 }
 0x1e6   : > { %1910 = vmatmul.mubr.bf16.vlgmr.msra.gmra.mrb[12].mxu0 %v1274_v0  ;;  %1950 = vmatmul.mubr.bf16.vlgmr.msra.gmra.mrb[12].mxu1 %v1276_v62 }
 0x279   : > { %v2301_v1 = vpop.f32.mrb[8].mxu0  ;;  %v2323_v2 = vpop.f32.mrb[8].mxu1 }
 0x27a   : > { %v2302_v4 = vpop.f32.mrb[9].mxu0  ;;  %v2324_v6 = vpop.f32.mrb[9].mxu1 }
 0x27b   : > { %v2303_v5 = vadd.f32 %v2302_v4, %v2301_v1  ;;  %v2304_v7 = vpop.f32.mrb[10].mxu0  ;;  %v2325_v8 = vadd.f32 %v2324_v6, %v2323_v2  ;;  %v2326_v9 = vpop.f32.mrb[10].mxu1 }
 0x27c   : > { %v2305_v10 = vpop.f32.mrb[11].mxu0  ;;  %v2327_v12 = vpop.f32.mrb[11].mxu1 }
 0x27d   : > { %v1832_v11 = vadd.f32 %v2303_v5, %v2215_v3 }
 0x27f   : > { %v1872_v14 = vadd.f32 %v2325_v8, %v1832_v11 }
 0x2b9   : > { %v2345_v15 = vpop.f32.mrb[12].mxu0  ;;  %v2367_v16 = vpop.f32.mrb[12].mxu1 }
 0x2ba   : > { %v2346_v17 = vpop.f32.mrb[13].mxu0  ;;  %v2368_v19 = vpop.f32.mrb[13].mxu1 }
 0x2bb   : > { %v2347_v18 = vadd.f32 %v2346_v17, %v2345_v15  ;;  %v2348_v20 = vpop.f32.mrb[14].mxu0  ;;  %v2369_v21 = vadd.f32 %v2368_v19, %v2367_v16  ;;  %v2370_v13 = vpop.f32.mrb[14].mxu1 }
 0x2bc   : > { %v2349_v22 = vpop.f32.mrb[15].mxu0  ;;  %v2371_v24 = vpop.f32.mrb[15].mxu1 }
 0x2bd   : > { %v1912_v23 = vadd.f32 %v2347_v18, %v1872_v14 }
 0x2bf   : > { %v1952_v25 = vadd.f32 %v2369_v21, %v1912_v23 }
 0x2c1   : > { %v1957_v26 = vmax.f32 %v1952_v25, 0.0 }
 0x2c3   : > { %1958 = vst [vmem:[%s282_s6] sm:$0xff] %v1957_v26 }
 0x2c4   : > { %2645 = shalt.err (!%p2642_p4)
}
 0x2c5   : > { %s2646_s15 = scalar_lea.hbm %s2997_s29, 128  ;;  %s2650_s24 = scalar_lea.hbm %s3046_s5, 256 }
 0x2c6   : > { %p2647_p0 = scmp.ne.s32.totalorder %s2997_s29, %s2646_s15  ;;  %p2651_p8 = scmp.lt.u32.totalorder %s2997_s29, %s3046_s5 }
 0x2c7   : > { %p2652_p13 = scmp.lt.u32.totalorder %s2650_s24, %s2646_s15  ;;  %p2654_p10 = scmp.lt.u32.totalorder %s2646_s15, %s2997_s29 }
 0x2c8   : > { %p2648_p9 = pnand %p2647_p0, %p2892_p5 }
 0x2c9   : > { %p2653_p6 = por %p2652_p13, %p2651_p8 }
 0x2ca   : > { %p2649_p11 = pneg %p2648_p9 }
 0x2cb   : > { %p2655_p3 = por %p2654_p10, %p2653_p6 }
 0x2cd   : > { %p2656_p7 = pnand %p2655_p3, %p2649_p11 }
 0x2cf   : > { %2659 = shalt.err (!%p2656_p7)
}
 0x2d0   : > { %2387 = dma.vmem_to_hbm [thread:$0]  (%p2892_p5), %s2999_s14, 128, %s2997_s29, %s1960_s9  }
 0x2d1 PF: > { %s1985_s13 = sand.u32 1, %s2694_s18   ;;  %p3064_p12 = scmp.ne.s32.totalorder %s3051_s25, 0 }
 0x2d2   : > { %p3065_p2 = scmp.ge.s32.totalorder %s2706_s21, 2  ;;  %s1986_s6 = scalar_lea.sflag [#allocation4], %s1985_s13 }
 0x2d4   : > { %p2404_p1 = pnand %p3065_p2, %p3064_p12 }
 0x2d6   : > { %2689 = dma.done.wait (!%p2404_p1), %s1986_s6, 128  }
 0x2d7   : > { %2691 = vsyncadd (!%p2404_p1), %s1986_s6, 4294967168  ;;  %p20_p4 = scmp.ge.s32.totalorder %s2878_s28, 4   ;;  %s3066_s18 = smov %s2698_s19 }
 0x2d8   : > { %s3067_s19 = smov %s2702_s20  ;;  %s3068_s20 = smov %s2888_s27 }
 0x2d9   : > { %s3069_s21 = smov %s2878_s28  ;;  %22 = sbr.rel (!%p20_p4) target bundleno = 7 (0x7), region = 97 }
 0x2e0   :  { %1991 = vsyncpa [#allocation3], 1 }
 0x2e1   :  { %1993 = vsyncpa [#allocation3 + $0x1], 1 }
 0x2e2   :  { %1994 = vsyncpa [#allocation6], 1 }
 0x2e3   :  { %1995 = vsyncpa [#allocation9], 1 }
 0x2e4   :  { %1996 = vsyncpa [#allocation4], 1 }
 0x2e5   :  { %1998 = vsyncpa [#allocation4 + $0x1], 1 }

</bundles_post_ra>
